<compile_context>
chip_gen: v7x
topology: tpu7x:2x2x1
jax: 0.10.0
libtpu: 0.0.40
codegen_flags: <defaults>
</compile_context>

<pallas_src>
import jax
import jax.numpy as jnp
from jax.experimental import pallas as pl
from jax.experimental.pallas import tpu as pltpu

_OUT_LANES = 128  # lane-dense output slab width (multiple of 128)


def _round_up(x, m):
    return (x + m - 1) // m * m


def _value_net_kernel(x_ref, w1_ref, b1_ref, w2_ref, b2_ref, w3_ref, b3_ref,
                      out_ref):
    # fc1 + ReLU  (MXU matmul, f32 accumulation; bias/ReLU in f32 on the VPU)
    h1 = jnp.dot(x_ref[...], w1_ref[...], preferred_element_type=jnp.float32)
    h1 = jnp.maximum(h1 + b1_ref[...], 0.0)
    # fc2 + ReLU  (cast back to the weight dtype so bf16 weights hit the
    # bf16 MXU path on v6e/v7x; no-op for f32)
    h2 = jnp.dot(h1.astype(w2_ref.dtype), w2_ref[...],
                 preferred_element_type=jnp.float32)
    h2 = jnp.maximum(h2 + b2_ref[...], 0.0)
    # fc3: output dim is 1 -> skip the MXU entirely.  VPU multiply against the
    # (1, H) weight row + XLU lane reduction, scalar bias from SMEM.
    v = jnp.sum(h2 * w3_ref[...].astype(jnp.float32), axis=-1,
                keepdims=True) + b3_ref[0, 0]
    # Lane-dense store: broadcast the (TB, 1) column across 128 lanes so the
    # store is an unmasked vst.  The wrapper slices column 0 back out.
    out_ref[...] = jnp.broadcast_to(v, out_ref.shape).astype(out_ref.dtype)


def value_net_forward(x, params, *, block_b=256):
    """x: (B, state_dim).  params: dict of transposed weights/biases.

    Weights are stored as (in_features, out_features) except fc3, which is the
    (1, hidden_dim) weight row; b3 is a (1, 1) scalar.
    """
    w1, b1 = params["w1"], params["b1"]   # (S, H), (1, H)
    w2, b2 = params["w2"], params["b2"]   # (H, H), (1, H)
    w3, b3 = params["w3"], params["b3"]   # (1, H), (1, 1)

    B, S = x.shape
    # Batch tile: multiple of 8 (sublane), capped so tiny batches stay tiny.
    tb = min(block_b, _round_up(B, 8))
    b_pad = _round_up(B, tb)
    if b_pad != B:
        x = jnp.pad(x, ((0, b_pad - B), (0, 0)))
    grid = (b_pad // tb,)

    # Weights/biases: full-array blocks with a constant index_map -> fetched
    # once, VMEM-resident for every grid step.
    resident = lambda arr: pl.BlockSpec(arr.shape, lambda i: (0,) * arr.ndim)

    out_padded = pl.pallas_call(
        _value_net_kernel,
        out_shape=jax.ShapeDtypeStruct((b_pad, _OUT_LANES), jnp.float32),
        grid=grid,
        in_specs=[
            pl.BlockSpec((tb, S), lambda i: (i, 0)),      # x: batch-tiled
            resident(w1),
            resident(b1),
            resident(w2),
            resident(b2),
            resident(w3),
            pl.BlockSpec((1, 1), lambda i: (0, 0),
                         memory_space=pltpu.MemorySpace.SMEM),  # scalar b3
        ],
        out_specs=pl.BlockSpec((tb, _OUT_LANES), lambda i: (i, 0)),
        compiler_params=pltpu.CompilerParams(
            dimension_semantics=("parallel",)),
    )(x, w1, b1, w2, b2, w3, b3)

    return out_padded[:B, :1]


def init_value_net_params(key, state_dim, hidden_dim, dtype=jnp.float32):
    """Mimics torch.nn.Linear default init (uniform +-1/sqrt(fan_in)).

    fc1/fc2 weights stored transposed (in, out); fc3 stored as its (1, H) row.
    Pass dtype=jnp.bfloat16 on v6e/v7x for the fast MXU path."""
    ks = jax.random.split(key, 6)

    def lin(kw, kb, fan_in, fan_out):
        bound = 1.0 / jnp.sqrt(jnp.float32(fan_in))
        w = jax.random.uniform(kw, (fan_in, fan_out), jnp.float32, -bound, bound)
        b = jax.random.uniform(kb, (1, fan_out), jnp.float32, -bound, bound)
        return w.astype(dtype), b.astype(jnp.float32)

    w1, b1 = lin(ks[0], ks[1], state_dim, hidden_dim)
    w2, b2 = lin(ks[2], ks[3], hidden_dim, hidden_dim)
    w3c, b3 = lin(ks[4], ks[5], hidden_dim, 1)
    w3 = w3c.reshape(1, hidden_dim)        # fc3 weight row (1, H)
    return {"w1": w1, "b1": b1, "w2": w2, "b2": b2, "w3": w3,
            "b3": b3.reshape(1, 1)}


def value_net_ref(x, p):
    """Pure-JAX reference for correctness check."""
    h = jnp.maximum(x @ p["w1"].astype(jnp.float32) + p["b1"], 0.0)
    h = jnp.maximum(h @ p["w2"].astype(jnp.float32) + p["b2"], 0.0)
    return jnp.sum(h * p["w3"].astype(jnp.float32), axis=-1,
                   keepdims=True) + p["b3"]


if __name__ == "__main__":
    # Small shapes consistent with the module: hidden_dim=64 from the spec,
    # state_dim is the flat per-agent Combat observation (synthetic here).
    state_dim = 32
    hidden_dim = 64

    key = jax.random.PRNGKey(0)
    kx, kp, kx2 = jax.random.split(key, 3)
    params = init_value_net_params(kp, state_dim, hidden_dim)

    # Test 1: tiny batch (single grid step).
    batch = 8
    x = jax.random.normal(kx, (batch, state_dim), dtype=jnp.float32)
    out = jax.block_until_ready(value_net_forward(x, params))
    ref = value_net_ref(x, params)
    assert out.shape == (batch, 1), out.shape
    assert jnp.allclose(out, ref, atol=1e-5, rtol=1e-5), (
        f"max abs err {jnp.max(jnp.abs(out - ref))}")

    # Test 2: non-multiple batch exercising grid > 1 and batch padding.
    batch2 = 300
    x2 = jax.random.normal(kx2, (batch2, state_dim), dtype=jnp.float32)
    out2 = jax.block_until_ready(value_net_forward(x2, params, block_b=128))
    ref2 = value_net_ref(x2, params)
    assert out2.shape == (batch2, 1), out2.shape
    assert jnp.allclose(out2, ref2, atol=1e-5, rtol=1e-5), (
        f"max abs err {jnp.max(jnp.abs(out2 - ref2))}")

    print("KERNEL_OK")
</pallas_src>

<mosaic_0001>
module attributes {stable_mosaic.version = 11 : i64} {
  func.func @_value_net_kernel(%arg0: i32, %arg1: memref<8x32xf32, #tpu.memory_space<vmem>>, %arg2: memref<32x64xf32, #tpu.memory_space<vmem>>, %arg3: memref<1x64xf32, #tpu.memory_space<vmem>>, %arg4: memref<64x64xf32, #tpu.memory_space<vmem>>, %arg5: memref<1x64xf32, #tpu.memory_space<vmem>>, %arg6: memref<1x64xf32, #tpu.memory_space<vmem>>, %arg7: memref<1x1xf32, #tpu.memory_space<smem>>, %arg8: memref<8x128xf32, #tpu.memory_space<vmem>>) attributes {dimension_semantics = [#tpu.dimension_semantics<parallel>], iteration_bounds = array<i64: 1>, scalar_prefetch = 0 : i64, scratch_operands = 0 : i64, tpu.core_type = #tpu.core_type<tc>, window_params = [{transform_indices = @transform_0, window_bounds = array<i64: 8, 32>}, {pipeline_mode = #tpu.pipeline_mode<synchronous>, transform_indices = @transform_1, window_bounds = array<i64: 32, 64>}, {pipeline_mode = #tpu.pipeline_mode<synchronous>, transform_indices = @transform_2, window_bounds = array<i64: 1, 64>}, {pipeline_mode = #tpu.pipeline_mode<synchronous>, transform_indices = @transform_3, window_bounds = array<i64: 64, 64>}, {pipeline_mode = #tpu.pipeline_mode<synchronous>, transform_indices = @transform_4, window_bounds = array<i64: 1, 64>}, {pipeline_mode = #tpu.pipeline_mode<synchronous>, transform_indices = @transform_5, window_bounds = array<i64: 1, 64>}, {transform_indices = @transform_6, window_bounds = array<i64: 1, 1>}, {transform_indices = @transform_7, window_bounds = array<i64: 8, 128>}]} {
    %c0 = arith.constant 0 : index
    %c0_0 = arith.constant 0 : index
    %0 = vector.load %arg1[%c0, %c0_0] : memref<8x32xf32, #tpu.memory_space<vmem>>, vector<8x32xf32>
    %c0_1 = arith.constant 0 : index
    %c0_2 = arith.constant 0 : index
    %1 = vector.load %arg2[%c0_1, %c0_2] : memref<32x64xf32, #tpu.memory_space<vmem>>, vector<32x64xf32>
    %cst = arith.constant dense<0.000000e+00> : vector<8x64xf32>
    %2 = tpu.matmul %0, %1, %cst {dimension_numbers = #tpu.dot_dimension_numbers<[1], [0], [0], [1], [0, 0, 1, 1], [], []>} : vector<8x32xf32>, vector<32x64xf32>, vector<8x64xf32> -> vector<8x64xf32>
    %c0_3 = arith.constant 0 : index
    %c0_4 = arith.constant 0 : index
    %3 = vector.load %arg3[%c0_3, %c0_4] : memref<1x64xf32, #tpu.memory_space<vmem>>, vector<1x64xf32>
    %4 = vector.broadcast %3 : vector<1x64xf32> to vector<8x64xf32>
    %5 = arith.addf %2, %4 : vector<8x64xf32>
    %cst_5 = arith.constant 0.000000e+00 : f32
    %6 = vector.broadcast %cst_5 : f32 to vector<8x64xf32>
    %7 = arith.maximumf %5, %6 : vector<8x64xf32>
    %c0_6 = arith.constant 0 : index
    %c0_7 = arith.constant 0 : index
    %8 = vector.load %arg4[%c0_6, %c0_7] : memref<64x64xf32, #tpu.memory_space<vmem>>, vector<64x64xf32>
    %cst_8 = arith.constant dense<0.000000e+00> : vector<8x64xf32>
    %9 = tpu.matmul %7, %8, %cst_8 {dimension_numbers = #tpu.dot_dimension_numbers<[1], [0], [0], [1], [0, 0, 1, 1], [], []>} : vector<8x64xf32>, vector<64x64xf32>, vector<8x64xf32> -> vector<8x64xf32>
    %c0_9 = arith.constant 0 : index
    %c0_10 = arith.constant 0 : index
    %10 = vector.load %arg5[%c0_9, %c0_10] : memref<1x64xf32, #tpu.memory_space<vmem>>, vector<1x64xf32>
    %11 = vector.broadcast %10 : vector<1x64xf32> to vector<8x64xf32>
    %12 = arith.addf %9, %11 : vector<8x64xf32>
    %cst_11 = arith.constant 0.000000e+00 : f32
    %13 = vector.broadcast %cst_11 : f32 to vector<8x64xf32>
    %14 = arith.maximumf %12, %13 : vector<8x64xf32>
    %c0_12 = arith.constant 0 : index
    %c0_13 = arith.constant 0 : index
    %15 = vector.load %arg6[%c0_12, %c0_13] : memref<1x64xf32, #tpu.memory_space<vmem>>, vector<1x64xf32>
    %16 = vector.broadcast %15 : vector<1x64xf32> to vector<8x64xf32>
    %17 = arith.mulf %14, %16 : vector<8x64xf32>
    %cst_14 = arith.constant dense<0.000000e+00> : vector<8xf32>
    %18 = vector.multi_reduction <add>, %17, %cst_14 [1] : vector<8x64xf32> to vector<8xf32>
    %19 = vector.shape_cast %18 : vector<8xf32> to vector<8x1xf32>
    %c0_15 = arith.constant 0 : index
    %c0_16 = arith.constant 0 : index
    %20 = memref.load %arg7[%c0_15, %c0_16] : memref<1x1xf32, #tpu.memory_space<smem>>
    %21 = vector.broadcast %20 : f32 to vector<8x1xf32>
    %22 = arith.addf %19, %21 : vector<8x1xf32>
    %23 = vector.shape_cast %22 : vector<8x1xf32> to vector<8x1xf32>
    %24 = vector.broadcast %23 : vector<8x1xf32> to vector<8x128xf32>
    %c0_17 = arith.constant 0 : index
    %c0_18 = arith.constant 0 : index
    %25 = vector.load %arg8[%c0_17, %c0_18] : memref<8x128xf32, #tpu.memory_space<vmem>>, vector<8x128xf32>
    tpu.vector_store %arg8[%c0_17, %c0_18], %24 {strides = array<i32>} : memref<8x128xf32, #tpu.memory_space<vmem>>, vector<8x128xf32>,
    return
  }
  func.func @transform_0(%arg0: i32) -> (i32, i32) {
    %c0_i32 = arith.constant 0 : i32
    %c0_i32_0 = arith.constant 0 : i32
    return %arg0, %c0_i32 : i32, i32
  }
  func.func @transform_1(%arg0: i32) -> (i32, i32) {
    %c0_i32 = arith.constant 0 : i32
    %c0_i32_0 = arith.constant 0 : i32
    %c0_i32_1 = arith.constant 0 : i32
    return %c0_i32, %c0_i32_0 : i32, i32
  }
  func.func @transform_2(%arg0: i32) -> (i32, i32) {
    %c0_i32 = arith.constant 0 : i32
    %c0_i32_0 = arith.constant 0 : i32
    %c0_i32_1 = arith.constant 0 : i32
    return %c0_i32, %c0_i32_0 : i32, i32
  }
  func.func @transform_3(%arg0: i32) -> (i32, i32) {
    %c0_i32 = arith.constant 0 : i32
    %c0_i32_0 = arith.constant 0 : i32
    %c0_i32_1 = arith.constant 0 : i32
    return %c0_i32, %c0_i32_0 : i32, i32
  }
  func.func @transform_4(%arg0: i32) -> (i32, i32) {
    %c0_i32 = arith.constant 0 : i32
    %c0_i32_0 = arith.constant 0 : i32
    %c0_i32_1 = arith.constant 0 : i32
    return %c0_i32, %c0_i32_0 : i32, i32
  }
  func.func @transform_5(%arg0: i32) -> (i32, i32) {
    %c0_i32 = arith.constant 0 : i32
    %c0_i32_0 = arith.constant 0 : i32
    %c0_i32_1 = arith.constant 0 : i32
    return %c0_i32, %c0_i32_0 : i32, i32
  }
  func.func @transform_6(%arg0: i32) -> (i32, i32) {
    %c0_i32 = arith.constant 0 : i32
    %c0_i32_0 = arith.constant 0 : i32
    %c0_i32_1 = arith.constant 0 : i32
    return %c0_i32, %c0_i32_0 : i32, i32
  }
  func.func @transform_7(%arg0: i32) -> (i32, i32) {
    %c0_i32 = arith.constant 0 : i32
    %c0_i32_0 = arith.constant 0 : i32
    return %arg0, %c0_i32 : i32, i32
  }
}

</mosaic_0001>

<bundles_post_ra>
// kernel: tpu_custom_call.1
= control target key start
LH: loop header
LB: loop body
LE: loop exit
PB: predicated region body
PF: predicated region fallthrough
CT: control target
= control target key end

     0   :  { %13 = vsyncpa [#allocation4], 0  ;;  %s560_s0 = inlined_call_operand.hbm [shape: f32[8,32], index: 0, kind: input, shape index: {}]   ;;  %s561_s1 = inlined_call_operand.hbm [shape: f32[32,64], index: 1, kind: input, shape index: {}]   ;;  %s562_s2 = inlined_call_operand.vmem [shape: f32[1,64], index: 2, kind: input, shape index: {}]   ;;  %s563_s3 = inlined_call_operand.hbm [shape: f32[64,64], index: 3, kind: input, shape index: {}]   ;;  %s564_s4 = inlined_call_operand.vmem [shape: f32[1,64], index: 4, kind: input, shape index: {}]   ;;  %s565_s5 = inlined_call_operand.vmem [shape: f32[1,64], index: 5, kind: input, shape index: {}]   ;;  %s566_s6 = inlined_call_operand.<no memory space> [shape: f32[1,1], index: 6, kind: input, shape index: {}]   ;;  %s567_s7 = inlined_call_operand.hbm [shape: f32[8,128], index: 7, kind: output, shape index: {}]  }
   0x1   :  { %14 = vsyncpa [#allocation7], 0 }
   0x2   :  { %15 = vsyncpa [#allocation5], 0  ;;  %s445_s24 = smov [#allocation6]   ;;  %s351_s28 = scalar_lea.hbm %s561_s1, 512 }
   0x3   :  { %s31_s25 = sshll.u32 %s445_s24, 4  ;;  %p352_p0 = scmp.ne.s32.totalorder %s561_s1, %s351_s28  ;;  %s32_s25 = int_to_ptr.vmem [resolvable:$true] %s31_s25 }
   0x4   :  { %p355_p1 = scmp.lt.u32.totalorder %s351_s28, %s561_s1 }
   0x6   :  { %p357_p2 = pnand %p355_p1, %p352_p0 }
   0x8   :  { %360 = shalt.err (!%p357_p2)
}
   0x9   :  { %s361_s10 = scalar_lea.vmem %s32_s25, 512  ;;  %p366_p4 = scmp.lt.s32.totalorder %s32_s25, %s32_s25 }
   0xa   :  { %p362_p3 = scmp.ne.s32.totalorder %s32_s25, %s361_s10  ;;  %p367_p5 = scmp.lt.s32.totalorder %s361_s10, %s361_s10 }
   0xc   :  { %p368_p6 = por %p367_p5, %p366_p4 }
   0xe   :  { %p369_p7 = pnand %p368_p6, %p362_p3 }
  0x10   :  { %372 = shalt.err (!%p369_p7)
}
  0x11   :  { %s446_s11 = smov 128   ;;  %s447_s12 = smov 8  }
  0x12   :  { %37 = dma.hbm_to_vmem [thread:$0]  %s561_s1, 512, %s32_s25, [#allocation7], %s446_s11, %s446_s11, %s447_s12  }
  0x13   :  { %s448_s15 = smov [#allocation3]   ;;  %s449_s17 = smov [#allocation8]  }
  0x14   :  { %s22_s16 = sshll.u32 %s448_s15, 4  ;;  %s45_s18 = sshll.u32 %s449_s17, 4  ;;  %s23_s16 = int_to_ptr.vmem [resolvable:$true] %s22_s16  ;;  %s46_s18 = int_to_ptr.vmem [resolvable:$true] %s45_s18 }
  0x15   :  { %s373_s21 = scalar_lea.hbm %s560_s0, 128 }
  0x16   :  { %p374_p8 = scmp.ne.s32.totalorder %s560_s0, %s373_s21  ;;  %p377_p9 = scmp.lt.u32.totalorder %s373_s21, %s560_s0 }
  0x18   :  { %p379_p10 = pnand %p377_p9, %p374_p8 }
  0x1a   :  { %382 = shalt.err (!%p379_p10)
}
  0x1b   :  { %s383_s1 = scalar_lea.vmem %s23_s16, 128  ;;  %p388_p12 = scmp.lt.s32.totalorder %s23_s16, %s23_s16 }
  0x1c   :  { %p384_p11 = scmp.ne.s32.totalorder %s23_s16, %s383_s1  ;;  %p389_p13 = scmp.lt.s32.totalorder %s383_s1, %s383_s1 }
  0x1e   :  { %p390_p0 = por %p389_p13, %p388_p12 }
  0x20   :  { %p391_p1 = pnand %p390_p0, %p384_p11 }
  0x22   :  { %394 = shalt.err (!%p391_p1)
}
  0x23   :  { %25 = dma.hbm_to_vmem [thread:$0]  %s560_s0, 128, %s23_s16, [#allocation4]  }
  0x24   :  { %s395_s30 = scalar_lea.hbm %s563_s3, 1024 }
  0x25   :  { %p396_p2 = scmp.ne.s32.totalorder %s563_s3, %s395_s30  ;;  %p399_p3 = scmp.lt.u32.totalorder %s395_s30, %s563_s3 }
  0x27   :  { %p401_p4 = pnand %p399_p3, %p396_p2 }
  0x29   :  { %404 = shalt.err (!%p401_p4)
}
  0x2a   :  { %s405_s14 = scalar_lea.vmem %s46_s18, 1024  ;;  %p410_p6 = scmp.lt.s32.totalorder %s46_s18, %s46_s18 }
  0x2b   :  { %p406_p5 = scmp.ne.s32.totalorder %s46_s18, %s405_s14  ;;  %p411_p7 = scmp.lt.s32.totalorder %s405_s14, %s405_s14 }
  0x2d   :  { %p412_p8 = por %p411_p7, %p410_p6 }
  0x2f   :  { %p413_p9 = pnand %p412_p8, %p406_p5 }
  0x31   :  { %416 = shalt.err (!%p413_p9)
}
  0x32   :  { %51 = dma.hbm_to_vmem [thread:$0]  %s563_s3, 1024, %s46_s18, [#allocation7], %s446_s11, %s446_s11, %s447_s12  }
  0x33   :  { %439 = dma.done.wait [#allocation4], 128  }
  0x34   :  { %440 = vsyncadd [#allocation4], 4294967168 }
  0x35   :  { %441 = dma.done.wait [#allocation7], 1536  }
  0x36   :  { %442 = vsyncadd [#allocation7], 4294965760  ;;  %v450_v0 = vmov 0.0|0.0   ;;  %vm451_vm0 = vmmov 0   ;;  %v452_v1 = vmov 0.0   ;;  %v68_v2 = vld [vmem:[#allocation6] sm:$0xff]  ;;  %v256_v34 = vstv %s566_s6 }
  0x37   :  { %324 = vmatprep.subr.bf16.mxu0 %v450_v0  ;;  %302 = vmatprep.mubr.msk.f32.mxu0 %vm451_vm0, %v452_v1  ;;  %v69_v3 = vld [vmem:[#allocation6 + $0x8] sm:$0xff]  ;;  %v70_v4 = vld [vmem:[#allocation6 + $0x10] sm:$0xff]  ;;  %v71_v6 = vld [vmem:[#allocation6 + $0x18] sm:$0xff]  ;;  %vm79_vm1 = vcmask 261120   ;;  %vm169_vm2 = vcmask 523264   ;;  %s453_s20 = smov [#allocation9]  }
  0x38   :  { %330 = vmatprep.subr.bf16.mxu1 %v450_v0  ;;  %321 = vmatprep.mubr.msk.f32.mxu1 %vm451_vm0, %v452_v1  ;;  %v325_v5 = vpack.c.bf16 %v69_v3, %v68_v2  ;;  %v154_v7 = vld [vmem:[#allocation8] sm:$0xff]  ;;  %v155_v8 = vld [vmem:[#allocation8 + $0x8] sm:$0xff]  ;;  %v156_v9 = vld [vmem:[#allocation8 + $0x10] sm:$0xff]  ;;  %v328_v11 = vpack.c.bf16 %v71_v6, %v70_v4  ;;  %s265_s21 = sshll.u32 %s453_s20, 4  ;;  %s266_s21 = int_to_ptr.vmem [resolvable:$true] %s265_s21 }
  0x39   :  { %v157_v10 = vld [vmem:[#allocation8 + $0x18] sm:$0xff]  ;;  %v331_v12 = vpack.c.bf16 %v155_v8, %v154_v7  ;;  %v158_v14 = vld [vmem:[#allocation8 + $0x20] sm:$0xff]  ;;  %v159_v15 = vld [vmem:[#allocation8 + $0x28] sm:$0xff]  ;;  %p422_p11 = scmp.lt.s32.totalorder %s266_s21, %s266_s21 }
  0x3a   :  { %326 = vmatpush3.bf16.msra.mxu0 %v325_v5  ;;  %v334_v13 = vpack.c.bf16 %v157_v10, %v156_v9  ;;  %v67_v16 = vld [vmem:[#allocation3] sm:$0xff]  ;;  %v337_v17 = vpack.c.bf16 %v159_v15, %v158_v14  ;;  %v160_v18 = vld [vmem:[#allocation8 + $0x30] sm:$0xff] }
  0x3b   :  { %327 = vmatprep.subr.bf16.mxu0 %v450_v0  ;;  %332 = vmatpush3.bf16.msra.mxu1 %v331_v12  ;;  %v161_v19 = vld [vmem:[#allocation8 + $0x38] sm:$0xff] }
  0x3c   :  { %333 = vmatprep.subr.bf16.mxu1 %v450_v0  ;;  %v340_v20 = vpack.c.bf16 %v161_v19, %v160_v18  ;;  %v275_v21 = vld [vmem:[%s562_s2] ss:$0 sm:$0xff] }
  0x3d   :  { %v277_v26 = vld [vmem:[%s564_s4] ss:$0 sm:$0xff]  ;;  %s417_s4 = scalar_lea.vmem %s266_s21, 128 }
  0x3e   :  { %329 = vmatpush3.bf16.msra.mxu0 %v328_v11  ;;  %v279_v30 = vld [vmem:[%s565_s5] ss:$0 sm:$0xff]  ;;  %p418_p10 = scmp.ne.s32.totalorder %s266_s21, %s417_s4  ;;  %p423_p12 = scmp.lt.s32.totalorder %s417_s4, %s417_s4 }
  0x3f   :  { %335 = vmatpush3.bf16.msra.mxu1 %v334_v13 }
  0x40   :  { %336 = vmatprep.subr.bf16.mxu1 %v450_v0  ;;  %p424_p13 = por %p423_p12, %p422_p11 }
  0x41   :  { %303 = vmatmul.mubr.msk.f32.vlgmr.msra.gmra.mrb[0].mxu0 %vm79_vm1, %v67_v16 }
  0x42   :  { %p425_p0 = pnand %p424_p13, %p418_p10 }
  0x43   :  { %338 = vmatpush3.bf16.msra.mxu1 %v337_v17 }
  0x44   :  { %339 = vmatprep.subr.bf16.mxu1 %v450_v0 }
  0x47   :  { %341 = vmatpush3.bf16.msra.mxu1 %v340_v20 }
 0x114   :  { %v149_v22 = vpop.f32.mrb[0].mxu0 }
 0x115   :  { %v150_v23 = vadd.f32 %v275_v21, %v149_v22  ;;  %v304_v24 = vpop.f32.mrb[1].mxu0 }
 0x117   :  { %v153_v25 = vmax.f32 %v150_v23, 0.0 }
 0x119   :  { %322 = vmatmul.mubr.msk.f32.vlgmr.msra.gmra.mrb[0].mxu1 %vm169_vm2, %v153_v25 }
 0x1ec   :  { %v239_v27 = vpop.f32.mrb[0].mxu1 }
 0x1ed   :  { %v240_v28 = vadd.f32 %v277_v26, %v239_v27  ;;  %v323_v29 = vpop.f32.mrb[1].mxu1 }
 0x1ef   :  { %v243_v31 = vmax.f32 %v240_v28, 0.0 }
 0x1f1   :  { %v251_v32 = vmul.f32 %v279_v30, %v243_v31 }
 0x1f3   :  { %v252_v33 = vsel %vm169_vm2, %v251_v32, 0.0 }
 0x1f4   :  { %253 = vadd.xlane.f32.xlu0 %v252_v33 }
 0x281   :  { %v254_v35 = vpop.xlane.xlu0 %253 }
 0x282   :  { %v257_v36 = vadd.f32 %v256_v34, %v254_v35 }
 0x284   :  { %258 = vst [vmem:[#allocation9] sm:$0xff] %v257_v36 }
 0x285   :  { %428 = shalt.err (!%p425_p0)
}
 0x286   :  { %s429_s23 = scalar_lea.hbm %s567_s7, 128 }
 0x287   :  { %p430_p1 = scmp.ne.s32.totalorder %s567_s7, %s429_s23  ;;  %p433_p2 = scmp.lt.u32.totalorder %s429_s23, %s567_s7 }
 0x289   :  { %p435_p3 = pnand %p433_p2, %p430_p1 }
 0x28b   :  { %438 = shalt.err (!%p435_p3)
}
 0x28c   :  { %268 = dma.vmem_to_hbm [thread:$0]  %s266_s21, 128, %s567_s7, [#allocation5]  }
 0x28d   :  { %443 = dma.done.wait [#allocation5], 128  }
 0x28e   :  { %444 = vsyncadd [#allocation5], 4294967168 }
 0x28f   :  { %272 = vsyncpa [#allocation4], 1 }
 0x290   :  { %273 = vsyncpa [#allocation7], 1 }
 0x291   :  { %274 = vsyncpa [#allocation5], 1 }

</bundles_post_ra>
